<compile_context>
chip_gen: v7x
topology: tpu7x:2x2x1
jax: 0.10.0
libtpu: 0.0.40
codegen_flags: <defaults>
</compile_context>

<pallas_src>
import jax
import jax.numpy as jnp
from jax.experimental import pallas as pl
from jax.experimental.pallas import tpu as pltpu

_SUBLANE = 8      # f32 sublane granularity for block shapes
_LANE = 128       # lane granularity


def _round_up(v, m):
    return (v + m - 1) // m * m


def _pad_cast_2d(a, rows, cols, dtype, fill=0.0):
    """Cast `a` to `dtype` and zero/fill-pad it to (rows, cols) iff needed."""
    r, c = a.shape
    a = a.astype(dtype)
    if (r, c) == (rows, cols):
        return a
    return jnp.pad(a, ((0, rows - r), (0, cols - c)), constant_values=fill)


def _choose_batch_tile(B, inp, O, Hp, Op, *,
                       vmem_budget_bytes=12 << 20,
                       max_batch_tile=2048,
                       min_grid_steps=2):
    """Pick (TB, B_pad, n_blocks, est_vmem_bytes) from a VMEM budget.

    Budget accounting for the default double-buffered BlockSpec pipeline:
      x block   : 2 * TB * inp * 4          (f32 input, cast to bf16 in-kernel)
      out block : 2 * TB * O   * 4          (f32 output, no lane padding)
      f32 temps : ~3 * TB * max(Hp, Op) * 4 (h / logits / exp)
      weights   : 2 * ((inp*Hp + Hp*Op)*2 + (Hp+Op)*4)   resident, counted
                  double for the default buffer_count=2.
    """
    per_row = 2 * inp * 4 + 2 * O * 4 + 3 * max(Hp, Op) * 4
    resident = 2 * ((inp * Hp + Hp * Op) * 2 + (Hp + Op) * 4)

    tb_cap = max(_SUBLANE, (vmem_budget_bytes - resident) // per_row)
    tb_cap = max(_SUBLANE, min(tb_cap, max_batch_tile) // _SUBLANE * _SUBLANE)

    nb = pl.cdiv(B, tb_cap)
    # Ask for >= min_grid_steps steps on non-tiny batches so the "parallel"
    # batch axis can be split across v7x's two TensorCores. Per-step overhead
    # (~0.35 us) is negligible, so this is harmless on single-TC v5e/v6e.
    if B >= 8 * _SUBLANE:
        nb = max(nb, min_grid_steps)

    tb = _round_up(pl.cdiv(B, nb), _SUBLANE)          # balanced tiles, 8-aligned
    b_pad = _round_up(B, tb)                          # pad only what is needed
    nb = b_pad // tb
    est_bytes = resident + per_row * tb
    return tb, b_pad, nb, est_bytes


def _mlp_softmax_kernel(x_ref, w1_ref, b1_ref, w2_ref, b2_ref, o_ref):
    out_width = o_ref.shape[-1]                       # real (unpadded) out dim

    # x arrives as f32 straight from HBM; the bf16 cast happens in-register.
    x = x_ref[...].astype(jnp.bfloat16)               # [TB, inp]

    # Linear 1 (MXU, f32 accumulation) + LeakyReLU (PyTorch default slope 0.01)
    # fused with the bf16 downcast -> only one (TB, Hp) f32 temp stays live.
    h = jnp.dot(x, w1_ref[...], preferred_element_type=jnp.float32) + b1_ref[...]
    h = jnp.where(h > 0, h, 0.01 * h).astype(jnp.bfloat16)

    # Linear 2 (MXU, f32 accumulation). Padded output lanes carry a -1e30 bias
    # (logits stay f32) so the softmax drops them: exp underflows to exactly 0.
    logits = (jnp.dot(h, w2_ref[...], preferred_element_type=jnp.float32)
              + b2_ref[...])                          # [TB, Op] f32

    # Softmax over the feature axis (dim=1). Exact per-row divide so rows sum
    # to 1 at f32 precision; it's a tiny column, off the HBM critical path.
    m = jnp.max(logits, axis=-1, keepdims=True)
    e = jnp.exp(logits - m)
    denom = jnp.sum(e, axis=-1, keepdims=True)
    probs = e / denom

    # Store only the real output lanes (block last dim == full array dim).
    o_ref[...] = probs[:, :out_width].astype(o_ref.dtype)


def nn_forward(x, w1, b1, w2, b2, *, max_batch_tile=2048):
    """Forward pass of NN as one fused, batch-tiled Pallas TPU kernel.

    x:  [B, inp]       (streamed per batch tile; cast to bf16 inside the kernel)
    w1: [inp, hidden]  (transpose of PyTorch's [out, in] layout)
    b1: [1, hidden]
    w2: [hidden, out]
    b2: [1, out]
    Returns softmax probabilities, shape [B, out], float32.
    """
    B, inp = x.shape
    H = w1.shape[1]
    O = w2.shape[1]

    # Feature padding (lane-dense MXU operands / in-VMEM logits only).
    Hp = _round_up(H, _LANE)
    Op = _round_up(O, _LANE)

    TB, B_pad, nb, est_bytes = _choose_batch_tile(
        B, inp, O, Hp, Op, max_batch_tile=max_batch_tile)

    f32, bf16 = jnp.float32, jnp.bfloat16

    # x: keep f32, pad rows only if the batch doesn't divide into tiles.
    x_in = x.astype(f32)
    if B_pad != B:
        x_in = jnp.pad(x_in, ((0, B_pad - B), (0, 0)))

    # Weights/biases: small, one-time pad + cast; resident in VMEM across grid.
    w1_p = _pad_cast_2d(w1, inp, Hp, bf16)
    b1_p = _pad_cast_2d(b1, 1, Hp, f32)
    w2_p = _pad_cast_2d(w2, Hp, Op, bf16)
    b2_p = _pad_cast_2d(b2, 1, Op, f32, fill=-1e30)   # padded logits -> -1e30

    vmem_limit = int(min(max(2 * est_bytes, 16 << 20), 32 << 20))

    out_p = pl.pallas_call(
        _mlp_softmax_kernel,
        out_shape=jax.ShapeDtypeStruct((B_pad, O), f32),   # no lane padding
        grid=(nb,),
        in_specs=[
            pl.BlockSpec((TB, inp), lambda i: (i, 0)),   # x: streamed per tile
            pl.BlockSpec((inp, Hp), lambda i: (0, 0)),   # W1: resident
            pl.BlockSpec((1, Hp), lambda i: (0, 0)),     # b1: resident
            pl.BlockSpec((Hp, Op), lambda i: (0, 0)),    # W2: resident
            pl.BlockSpec((1, Op), lambda i: (0, 0)),     # b2: resident
        ],
        out_specs=pl.BlockSpec((TB, O), lambda i: (i, 0)),
        compiler_params=pltpu.CompilerParams(
            dimension_semantics=("parallel",),
            vmem_limit_bytes=vmem_limit,
        ),
    )(x_in, w1_p, b1_p, w2_p, b2_p)

    return out_p[:B] if B_pad != B else out_p


def init_params(key, inp_size, hidden_size, out_size):
    """Deterministic init mimicking nn.Linear's U(-1/sqrt(fan_in), 1/sqrt(fan_in))."""
    k1, k2, k3, k4 = jax.random.split(key, 4)
    bound1 = 1.0 / jnp.sqrt(inp_size)
    bound2 = 1.0 / jnp.sqrt(hidden_size)
    w1 = jax.random.uniform(k1, (inp_size, hidden_size), jnp.float32, -bound1, bound1)
    b1 = jax.random.uniform(k2, (1, hidden_size), jnp.float32, -bound1, bound1)
    w2 = jax.random.uniform(k3, (hidden_size, out_size), jnp.float32, -bound2, bound2)
    b2 = jax.random.uniform(k4, (1, out_size), jnp.float32, -bound2, bound2)
    return w1, b1, w2, b2


if __name__ == "__main__":
    # Small shapes consistent with the module: batch=8, inp=32, hidden=64, out=16.
    inp_size, hidden_size, out_size = 32, 64, 16
    batch = 8

    key = jax.random.PRNGKey(0)
    kx, kp = jax.random.split(key)
    x = jax.random.normal(kx, (batch, inp_size), jnp.float32)
    w1, b1, w2, b2 = init_params(kp, inp_size, hidden_size, out_size)

    fwd = jax.jit(nn_forward)
    out = jax.block_until_ready(fwd(x, w1, b1, w2, b2))

    # Pure-f32 reference of the same math. Tolerance reflects bf16 MXU operands
    # (with f32 accumulation) inside the kernel.
    h_ref = x @ w1 + b1
    h_ref = jnp.where(h_ref > 0, h_ref, 0.01 * h_ref)
    logits_ref = h_ref @ w2 + b2
    ref = jax.nn.softmax(logits_ref, axis=1)

    assert out.shape == (batch, out_size), f"bad output shape {out.shape}"
    assert jnp.allclose(out, ref, atol=1e-2, rtol=1e-2), "mismatch vs reference"
    assert jnp.allclose(jnp.sum(out, axis=1), 1.0, atol=1e-3), "softmax rows must sum to ~1"

    print("KERNEL_OK")
</pallas_src>

<mosaic_0001>
module attributes {stable_mosaic.version = 11 : i64} {
  func.func @_mlp_softmax_kernel(%arg0: i32, %arg1: memref<8x32xf32, #tpu.memory_space<vmem>>, %arg2: memref<32x128xbf16, #tpu.memory_space<vmem>>, %arg3: memref<1x128xf32, #tpu.memory_space<vmem>>, %arg4: memref<128x128xbf16, #tpu.memory_space<vmem>>, %arg5: memref<1x128xf32, #tpu.memory_space<vmem>>, %arg6: memref<8x16xf32, #tpu.memory_space<vmem>>) attributes {dimension_semantics = [#tpu.dimension_semantics<parallel>], iteration_bounds = array<i64: 1>, scalar_prefetch = 0 : i64, scratch_operands = 0 : i64, tpu.core_type = #tpu.core_type<tc>, window_params = [{transform_indices = @transform_0, window_bounds = array<i64: 8, 32>}, {pipeline_mode = #tpu.pipeline_mode<synchronous>, transform_indices = @transform_1, window_bounds = array<i64: 32, 128>}, {pipeline_mode = #tpu.pipeline_mode<synchronous>, transform_indices = @transform_2, window_bounds = array<i64: 1, 128>}, {pipeline_mode = #tpu.pipeline_mode<synchronous>, transform_indices = @transform_3, window_bounds = array<i64: 128, 128>}, {pipeline_mode = #tpu.pipeline_mode<synchronous>, transform_indices = @transform_4, window_bounds = array<i64: 1, 128>}, {transform_indices = @transform_5, window_bounds = array<i64: 8, 16>}]} {
    %c0 = arith.constant 0 : index
    %c0_0 = arith.constant 0 : index
    %0 = vector.load %arg1[%c0, %c0_0] : memref<8x32xf32, #tpu.memory_space<vmem>>, vector<8x32xf32>
    %1 = arith.truncf %0 : vector<8x32xf32> to vector<8x32xbf16>
    %c0_1 = arith.constant 0 : index
    %c0_2 = arith.constant 0 : index
    %2 = vector.load %arg2[%c0_1, %c0_2] : memref<32x128xbf16, #tpu.memory_space<vmem>>, vector<32x128xbf16>
    %cst = arith.constant dense<0.000000e+00> : vector<8x128xf32>
    %3 = tpu.matmul %1, %2, %cst {dimension_numbers = #tpu.dot_dimension_numbers<[1], [0], [0], [1], [0, 0, 1, 1], [], []>} : vector<8x32xbf16>, vector<32x128xbf16>, vector<8x128xf32> -> vector<8x128xf32>
    %c0_3 = arith.constant 0 : index
    %c0_4 = arith.constant 0 : index
    %4 = vector.load %arg3[%c0_3, %c0_4] : memref<1x128xf32, #tpu.memory_space<vmem>>, vector<1x128xf32>
    %5 = vector.broadcast %4 : vector<1x128xf32> to vector<8x128xf32>
    %6 = arith.addf %3, %5 : vector<8x128xf32>
    %cst_5 = arith.constant 0.000000e+00 : f32
    %7 = vector.broadcast %cst_5 : f32 to vector<8x128xf32>
    %8 = arith.cmpf ogt, %6, %7 : vector<8x128xf32>
    %cst_6 = arith.constant 0.00999999977 : f32
    %9 = vector.broadcast %cst_6 : f32 to vector<8x128xf32>
    %10 = arith.mulf %9, %6 : vector<8x128xf32>
    %11 = arith.select %8, %6, %10 : vector<8x128xi1>, vector<8x128xf32>
    %12 = arith.truncf %11 : vector<8x128xf32> to vector<8x128xbf16>
    %c0_7 = arith.constant 0 : index
    %c0_8 = arith.constant 0 : index
    %13 = vector.load %arg4[%c0_7, %c0_8] : memref<128x128xbf16, #tpu.memory_space<vmem>>, vector<128x128xbf16>
    %cst_9 = arith.constant dense<0.000000e+00> : vector<8x128xf32>
    %14 = tpu.matmul %12, %13, %cst_9 {dimension_numbers = #tpu.dot_dimension_numbers<[1], [0], [0], [1], [0, 0, 1, 1], [], []>} : vector<8x128xbf16>, vector<128x128xbf16>, vector<8x128xf32> -> vector<8x128xf32>
    %c0_10 = arith.constant 0 : index
    %c0_11 = arith.constant 0 : index
    %15 = vector.load %arg5[%c0_10, %c0_11] : memref<1x128xf32, #tpu.memory_space<vmem>>, vector<1x128xf32>
    %16 = vector.broadcast %15 : vector<1x128xf32> to vector<8x128xf32>
    %17 = arith.addf %14, %16 : vector<8x128xf32>
    %cst_12 = arith.constant dense<0xFF800000> : vector<8xf32>
    %18 = vector.multi_reduction <maximumf>, %17, %cst_12 [1] : vector<8x128xf32> to vector<8xf32>
    %19 = vector.shape_cast %18 : vector<8xf32> to vector<8x1xf32>
    %20 = vector.broadcast %19 : vector<8x1xf32> to vector<8x128xf32>
    %21 = arith.subf %17, %20 : vector<8x128xf32>
    %22 = math.exp %21 : vector<8x128xf32>
    %cst_13 = arith.constant dense<0.000000e+00> : vector<8xf32>
    %23 = vector.multi_reduction <add>, %22, %cst_13 [1] : vector<8x128xf32> to vector<8xf32>
    %24 = vector.shape_cast %23 : vector<8xf32> to vector<8x1xf32>
    %25 = vector.broadcast %24 : vector<8x1xf32> to vector<8x128xf32>
    %26 = arith.divf %22, %25 : vector<8x128xf32>
    %27 = vector.extract_strided_slice %26 {offsets = [0, 0], sizes = [8, 16], strides = [1, 1]} : vector<8x128xf32> to vector<8x16xf32>
    %c0_14 = arith.constant 0 : index
    %c0_15 = arith.constant 0 : index
    %28 = vector.load %arg6[%c0_14, %c0_15] : memref<8x16xf32, #tpu.memory_space<vmem>>, vector<8x16xf32>
    tpu.vector_store %arg6[%c0_14, %c0_15], %27 {strides = array<i32>} : memref<8x16xf32, #tpu.memory_space<vmem>>, vector<8x16xf32>,
    return
  }
  func.func @transform_0(%arg0: i32) -> (i32, i32) {
    %c0_i32 = arith.constant 0 : i32
    %c0_i32_0 = arith.constant 0 : i32
    return %arg0, %c0_i32 : i32, i32
  }
  func.func @transform_1(%arg0: i32) -> (i32, i32) {
    %c0_i32 = arith.constant 0 : i32
    %c0_i32_0 = arith.constant 0 : i32
    %c0_i32_1 = arith.constant 0 : i32
    return %c0_i32, %c0_i32_0 : i32, i32
  }
  func.func @transform_2(%arg0: i32) -> (i32, i32) {
    %c0_i32 = arith.constant 0 : i32
    %c0_i32_0 = arith.constant 0 : i32
    %c0_i32_1 = arith.constant 0 : i32
    return %c0_i32, %c0_i32_0 : i32, i32
  }
  func.func @transform_3(%arg0: i32) -> (i32, i32) {
    %c0_i32 = arith.constant 0 : i32
    %c0_i32_0 = arith.constant 0 : i32
    %c0_i32_1 = arith.constant 0 : i32
    return %c0_i32, %c0_i32_0 : i32, i32
  }
  func.func @transform_4(%arg0: i32) -> (i32, i32) {
    %c0_i32 = arith.constant 0 : i32
    %c0_i32_0 = arith.constant 0 : i32
    %c0_i32_1 = arith.constant 0 : i32
    return %c0_i32, %c0_i32_0 : i32, i32
  }
  func.func @transform_5(%arg0: i32) -> (i32, i32) {
    %c0_i32 = arith.constant 0 : i32
    %c0_i32_0 = arith.constant 0 : i32
    return %arg0, %c0_i32 : i32, i32
  }
}

</mosaic_0001>

<bundles_post_ra>
// kernel: nn_forward.1
= control target key start
LH: loop header
LB: loop body
LE: loop exit
PB: predicated region body
PF: predicated region fallthrough
CT: control target
= control target key end

     0   :  { %v325_v1 = vmov 0.0   ;;  %vm326_vm0 = vmmov 0   ;;  %vm47_vm1 = vcmask 261120   ;;  %s409_s0 = inlined_call_operand.vmem [shape: f32[8,32], index: 0, kind: input, shape index: {}]   ;;  %s410_s1 = inlined_call_operand.vmem [shape: bf16[32,128], index: 1, kind: input, shape index: {}]   ;;  %s411_s2 = inlined_call_operand.vmem [shape: f32[1,128], index: 2, kind: input, shape index: {}]   ;;  %s412_s3 = inlined_call_operand.vmem [shape: bf16[128,128], index: 3, kind: input, shape index: {}]   ;;  %s413_s4 = inlined_call_operand.vmem [shape: f32[1,128], index: 4, kind: input, shape index: {}]   ;;  %s414_s5 = inlined_call_operand.hbm [shape: f32[8,16], index: 5, kind: output, shape index: {}]  }
   0x1   :  { %v287_v0 = vld [vmem:[%s410_s1] sm:$0xff]   ;;  %256 = vmatprep.subr.bf16.mxu0 %v325_v1  ;;  %v288_v2 = vld [vmem:[%s410_s1 + $0x8] sm:$0xff]   ;;  %264 = vmatprep.subr.bf16.mxu1 %v325_v1  ;;  %v291_v7 = vld [vmem:[%s412_s3 + $0x10] sm:$0xff]  }
   0x2   :  { %257 = vmatpush3.bf16.msra.mxu0 %v287_v0  ;;  %260 = vmatprep.mubr.msk.bf16.mxu0 %vm326_vm0, %v325_v1  ;;  %v22_v3 = vld [vmem:[%s409_s0] sm:$0xff]  ;;  %v290_v6 = vld [vmem:[%s412_s3 + $0x8] sm:$0xff]  }
   0x3   :  { %258 = vmatprep.subr.bf16.mxu0 %v325_v1  ;;  %v289_v4 = vld [vmem:[%s412_s3] sm:$0xff]   ;;  %280 = vmatprep.mubr.msk.bf16.mxu1 %vm326_vm0, %v325_v1  ;;  %v23_v5 = vpack.c.bf16 %v22_v3, %v22_v3 }
   0x4   :  { %265 = vmatpush3.bf16.msra.mxu1 %v289_v4 }
   0x5   :  { %266 = vmatprep.subr.bf16.mxu1 %v325_v1 }
   0x6   :  { %259 = vmatpush3.bf16.msra.mxu0 %v288_v2 }
   0x8   :  { %267 = vmatpush3.bf16.msra.mxu1 %v290_v6 }
   0x9   :  { %261 = vmatmul.mubr.msk.bf16.vlgmr.msra.gmra.mrb[0].mxu0 %vm47_vm1, %v23_v5  ;;  %268 = vmatprep.subr.bf16.mxu1 %v325_v1 }
   0xa   :  { %10 = vsyncpa [#allocation3], 0  ;;  %v292_v8 = vld [vmem:[%s412_s3 + $0x18] sm:$0xff]   ;;  %v293_v9 = vld [vmem:[%s412_s3 + $0x20] sm:$0xff]   ;;  %vm215_vm3 = vcmask 130048  }
   0xb   :  { %v294_v10 = vld [vmem:[%s412_s3 + $0x28] sm:$0xff]   ;;  %v295_v11 = vld [vmem:[%s412_s3 + $0x30] sm:$0xff]   ;;  %v296_v12 = vld [vmem:[%s412_s3 + $0x38] sm:$0xff]  }
   0xc   :  { %269 = vmatpush3.bf16.msra.mxu1 %v291_v7  ;;  %v231_v13 = vld [vmem:[%s411_s2] ss:$0 sm:$0xff]  ;;  %s327_s2 = smov [#allocation2]  }
   0xd   :  { %270 = vmatprep.subr.bf16.mxu1 %v325_v1  ;;  %v235_v22 = vld [vmem:[%s413_s4] ss:$0 sm:$0xff]  ;;  %s223_s3 = sshll.u32 %s327_s2, 4  ;;  %s224_s3 = int_to_ptr.vmem [resolvable:$true] %s223_s3 }
   0xe   :  { %s301_s4 = scalar_lea.vmem %s224_s3, 128  ;;  %p306_p1 = scmp.lt.s32.totalorder %s224_s3, %s224_s3 }
   0xf   :  { %p302_p0 = scmp.ne.s32.totalorder %s224_s3, %s301_s4  ;;  %p307_p2 = scmp.lt.s32.totalorder %s301_s4, %s301_s4 }
  0x10   :  { %271 = vmatpush3.bf16.msra.mxu1 %v292_v8 }
  0x11   :  { %272 = vmatprep.subr.bf16.mxu1 %v325_v1  ;;  %p308_p3 = por %p307_p2, %p306_p1 }
  0x13   :  { %p309_p4 = pnand %p308_p3, %p302_p0 }
  0x14   :  { %273 = vmatpush3.bf16.msra.mxu1 %v293_v9 }
  0x15   :  { %274 = vmatprep.subr.bf16.mxu1 %v325_v1 }
  0x18   :  { %275 = vmatpush3.bf16.msra.mxu1 %v294_v10 }
  0x19   :  { %276 = vmatprep.subr.bf16.mxu1 %v325_v1 }
  0x1c   :  { %277 = vmatpush3.bf16.msra.mxu1 %v295_v11 }
  0x1d   :  { %278 = vmatprep.subr.bf16.mxu1 %v325_v1 }
  0x20   :  { %279 = vmatpush3.bf16.msra.mxu1 %v296_v12 }
  0xdc   :  { %v85_v14 = vpop.f32.mrb[0].mxu0 }
  0xdd   :  { %v86_v15 = vadd.f32 %v231_v13, %v85_v14  ;;  %v262_v16 = vpop.f32.mrb[1].mxu0 }
  0xde   :  { %v88_v17 = vpop.f32.mrb[2].mxu0 }
  0xdf   :  { %vm91_vm2 = vcmp.gt.f32.partialorder %v86_v15, 0.0  ;;  %v92_v18 = vmul.f32 0.01, %v86_v15  ;;  %v263_v19 = vpop.f32.mrb[3].mxu0 }
  0xe1   :  { %v93_v20 = vsel %vm91_vm2, %v86_v15, %v92_v18 }
  0xe2   :  { %v94_v21 = vpack.c.bf16 %v93_v20, %v93_v20 }
  0xe4   :  { %281 = vmatmul.mubr.bf16.vlgmr.msra.gmra.mrb[0].mxu1 %v94_v21 }
 0x1b7   :  { %v200_v23 = vpop.f32.mrb[0].mxu1 }
 0x1b8   :  { %v201_v24 = vadd.f32 %v235_v22, %v200_v23  ;;  %v282_v25 = vpop.f32.mrb[1].mxu1 }
 0x1b9   :  { %v203_v26 = vpop.f32.mrb[2].mxu1 }
 0x1ba   :  { %206 = vmax.xlane.f32.xlu0 %v201_v24  ;;  %v283_v27 = vpop.f32.mrb[3].mxu1 }
 0x247   :  { %v207_v28 = vpop.xlane.xlu0 %206 }
 0x248   :  { %v208_v29 = vsub.f32 %v201_v24, %v207_v28 }
 0x24a   :  { %v209_v30 = vmul.f32 1.442695, %v208_v29 }
 0x24c   :  { %297 = vpow2.f32 %v209_v30 }
 0x256   :  { %v298_v31 = vpop.eup %297 }
 0x257   :  { %211 = vadd.xlane.f32.xlu0 %v298_v31 }
 0x2e4   :  { %v212_v32 = vpop.xlane.xlu0 %211 }
 0x2e5   :  { %299 = vrcp.f32 %v212_v32 }
 0x2ef   :  { %v300_v33 = vpop.eup %299 }
 0x2f0   :  { %v214_v34 = vmul.f32 %v300_v33, %v298_v31 }
 0x2f2   :  { %216 = vst.msk [vmem:[#allocation2] sm:$0xff] %vm215_vm3, %v214_v34 }
 0x2f3   :  { %312 = shalt.err (!%p309_p4)
}
 0x2f4   :  { %s313_s19 = scalar_lea.hbm %s414_s5, 128 }
 0x2f5   :  { %p314_p5 = scmp.ne.s32.totalorder %s414_s5, %s313_s19  ;;  %p317_p6 = scmp.lt.u32.totalorder %s313_s19, %s414_s5 }
 0x2f7   :  { %p319_p7 = pnand %p317_p6, %p314_p5 }
 0x2f9   :  { %322 = shalt.err (!%p319_p7)
}
 0x2fa   :  { %226 = dma.vmem_to_hbm [thread:$0]  %s224_s3, 128, %s414_s5, [#allocation3]  }
 0x2fb   :  { %323 = dma.done.wait [#allocation3], 128  }
 0x2fc   :  { %324 = vsyncadd [#allocation3], 4294967168 }
 0x2fd   :  { %230 = vsyncpa [#allocation3], 1 }

</bundles_post_ra>
